<compile_context>
chip_gen: v5e
topology: v5e:2x2
jax: 0.10.0
libtpu: 0.0.40
codegen_flags: <defaults>
</compile_context>

<pallas_src>
import jax
import jax.numpy as jnp
from jax import lax
from jax.experimental import pallas as pl
from jax.experimental.pallas import tpu as pltpu

_LANE = 128


def _round_up(n, m):
    return ((n + m - 1) // m) * m


def act_kernel(slab_ref, w_ref, b_ref, out_ref):
    """One batch tile of the Categorical head.

    slab_ref : (TB, K_slab) bf16   [avail | x | masked_father | zero pad]
    w_ref    : (K_slab, A_out) bf16 (zero rows under avail / pad columns)
    b_ref    : (1, A_out) f32
    out_ref  : (TB, 2) f32         col 0 = action (as f32), col 1 = log_prob
    """
    a_out = w_ref.shape[-1]

    slab = slab_ref[...]                               # (TB, K_slab) bf16

    # Single fused matmul (bf16 x bf16 -> f32 accumulate) over the whole slab;
    # avail / pad columns hit zero weight rows so they contribute nothing.
    logits = jnp.dot(slab, w_ref[...], preferred_element_type=jnp.float32)
    logits = logits + b_ref[...]                       # (TB, A_out) f32

    # Availability mask lives in the first A_out lanes of the slab (values 0/1,
    # exact in bf16).  torch: x[available_actions == 0] = -1e10
    avail = slab_ref[:, :a_out].astype(jnp.float32)    # (TB, A_out)
    logits = jnp.where(avail == 0.0, jnp.float32(-1e10), logits)

    # mode: first-max index along last axis (matches torch.argmax tie-break).
    max_logit = jnp.max(logits, axis=-1, keepdims=True)
    idx = lax.broadcasted_iota(jnp.int32, logits.shape, 1)
    action = jnp.min(jnp.where(logits == max_logit, idx, jnp.int32(a_out)),
                     axis=-1, keepdims=True)           # (TB, 1) int32
    action = jnp.minimum(action, jnp.int32(a_out - 1))  # NaN guard, keep in range

    # log_softmax at the argmax: z[action] == 0  =>  log_prob == -lse.
    lse = jnp.log(jnp.sum(jnp.exp(logits - max_logit), axis=-1, keepdims=True))

    # packed output: col 0 = action (exact in f32 for a_out < 2^24), col 1 = logp
    out_ref[...] = jnp.concatenate([action.astype(jnp.float32), -lse], axis=-1)


def prepare_act_params(W, b):
    """One-time layout prep (hoisted out of the per-step forward path).

    W : (A_out, K_feat) f32 Categorical linear weight;  b : (A_out,) f32 bias.
    Returns
      Wt_padded : (K_slab, A_out) bf16 with K_slab = round_up(A_out+K_feat, 128).
                  Rows [0, A_out) (avail columns) and [A_out+K_feat, K_slab)
                  (lane padding) are zero.
      b2        : (1, A_out) f32
    """
    W = jnp.asarray(W, jnp.float32)
    A_out, K_feat = W.shape
    K_slab = _round_up(A_out + K_feat, _LANE)
    Wt = jnp.zeros((K_slab, A_out), jnp.float32).at[A_out:A_out + K_feat].set(W.T)
    return Wt.astype(jnp.bfloat16), jnp.asarray(b, jnp.float32).reshape(1, -1)


def _choose_tiling(batch, target_tile=2048):
    """Pad B only to a multiple of 8, then split into grid blocks.

    Guarantees >= 2 blocks whenever the batch allows (keeps both v7x
    TensorCores busy under "parallel" sharding) and uses the same large tile on
    every generation: the double-buffered footprint (~3 MiB at K_slab=128) is
    far below even v5e's 16 MiB default scoped-VMEM limit.
    """
    padded_b = _round_up(max(batch, 1), 8)
    grid_n = pl.cdiv(padded_b, target_tile)
    if grid_n < 2 and padded_b >= 16:
        grid_n = 2
    tile_b = _round_up(pl.cdiv(padded_b, grid_n), 8)
    padded_b = tile_b * grid_n
    return tile_b, padded_b, grid_n


def act_layer_forward(x, one_hot_actions, execution_masks, available_actions,
                      Wt, b2):
    """Discrete ACTLayer.forward (execution-mask branch, deterministic mode).

    x:(B,Dx)  one_hot_actions:(B,A,D)  execution_masks:(B,A)
    available_actions:(B,A_out) or None
    Wt:(K_slab, A_out) bf16 (from prepare_act_params)   b2:(1, A_out) f32
    returns (actions (B,1) int32, action_log_probs (B,1) f32,
             masked_actions (B, A*D) f32)
    """
    B, Dx = x.shape
    _, A, D = one_hot_actions.shape
    K_slab, A_out = Wt.shape
    K_feat = Dx + A * D
    assert K_slab == _round_up(A_out + K_feat, _LANE)
    assert A_out < (1 << 24)       # action index round-trips exactly through f32

    # masked "father" actions + feature concat — cheap elementwise, fuses in XLA.
    father = (one_hot_actions.astype(jnp.float32)
              * execution_masks.astype(jnp.float32)[..., None]).reshape(B, A * D)

    if available_actions is None:
        avail = jnp.ones((B, A_out), jnp.float32)
    else:
        avail = available_actions.astype(jnp.float32)

    # Single fused, lane-dense bf16 slab:
    #   [ avail (A_out) | x (Dx) | father (A*D) | zero pad to K_slab ]
    # NOTE: bf16 rounding of x / W can flip the argmax vs the torch f32 linear
    # in near-tie cases (acceptable for an RL policy head).
    slab = jnp.concatenate([avail, x.astype(jnp.float32), father], axis=1)
    slab = slab.astype(jnp.bfloat16)

    tile_b, padded_b, grid_n = _choose_tiling(B)
    slab = jnp.pad(slab, ((0, padded_b - B), (0, K_slab - (A_out + K_feat))))
    # Padded rows are all-zero (avail = 0 -> every logit is -1e10, lse finite,
    # argmax 0); they are sliced off below, and nothing reduces over the batch
    # inside the kernel.

    out = pl.pallas_call(
        act_kernel,
        out_shape=jax.ShapeDtypeStruct((padded_b, 2), jnp.float32),
        grid=(grid_n,),
        in_specs=[
            pl.BlockSpec((tile_b, K_slab), lambda i: (i, 0)),   # fused slab
            pl.BlockSpec((K_slab, A_out), lambda i: (0, 0)),    # weight (resident)
            pl.BlockSpec((1, A_out), lambda i: (0, 0)),         # bias   (resident)
        ],
        out_specs=pl.BlockSpec((tile_b, 2), lambda i: (i, 0)),
        compiler_params=pltpu.CompilerParams(
            dimension_semantics=("parallel",)),
    )(slab, Wt, b2)

    actions = out[:B, 0:1].astype(jnp.int32)      # torch returns int64; int32 here
    action_log_probs = out[:B, 1:2]
    # torch return views: actions.view(-1,1), log_probs.view(-1,1),
    #                     masked_actions.view(B, -1)
    return actions, action_log_probs, father


if __name__ == "__main__":
    key = jax.random.PRNGKey(0)
    B, Dx, A, D = 8, 32, 4, 6          # batch, obs-feature dim, num agents, Discrete n
    A_out = D                          # Categorical output dim = action_space.n
    inputs_dim = Dx + A * D            # Categorical linear in_features

    k1, k2, k3, k4, k5 = jax.random.split(key, 5)
    x = jax.random.normal(k1, (B, Dx), jnp.float32)
    prev_idx = jax.random.randint(k2, (B, A), 0, D)
    one_hot_actions = jax.nn.one_hot(prev_idx, D, dtype=jnp.float32)      # (B, A, D)
    execution_masks = (jax.random.uniform(k3, (B, A)) > 0.5).astype(jnp.float32)
    available_actions = jnp.ones((B, A_out), jnp.float32)
    available_actions = available_actions.at[:, -1].set(
        (jax.random.uniform(k4, (B,)) > 0.3).astype(jnp.float32))

    # deterministic parameter init (gain=0.01 output layer, zero bias — as in init_())
    W = 0.01 * jax.random.normal(k5, (A_out, inputs_dim), jnp.float32)
    b = jnp.zeros((A_out,), jnp.float32)

    Wt, b2 = prepare_act_params(W, b)   # one-time layout prep
    actions, action_log_probs, father_actions = act_layer_forward(
        x, one_hot_actions, execution_masks, available_actions, Wt, b2)
    jax.block_until_ready((actions, action_log_probs, father_actions))

    # reference (same bf16-rounded operands, f32 math) for a sanity check
    feats_ref = jnp.concatenate(
        [x, (one_hot_actions * execution_masks[..., None]).reshape(B, -1)],
        axis=1).astype(jnp.bfloat16).astype(jnp.float32)
    Wt_core = Wt[A_out:A_out + inputs_dim].astype(jnp.float32)   # bf16-rounded W.T
    ref_logits = feats_ref @ Wt_core + b2
    ref_logits = jnp.where(available_actions == 0.0, jnp.float32(-1e10), ref_logits)
    ref_action = jnp.argmax(ref_logits, axis=-1, keepdims=True).astype(jnp.int32)
    ref_logp = jnp.take_along_axis(jax.nn.log_softmax(ref_logits, axis=-1),
                                   ref_action, axis=-1)
    ref_father = (one_hot_actions * execution_masks[..., None]).reshape(B, -1)

    assert actions.shape == (B, 1)
    assert action_log_probs.shape == (B, 1)
    assert father_actions.shape == (B, A * D)
    assert jnp.array_equal(actions, ref_action)
    assert jnp.allclose(action_log_probs, ref_logp, atol=1e-3)
    assert jnp.allclose(father_actions, ref_father)
    print("KERNEL_OK")
</pallas_src>

<mosaic_0001>
module attributes {stable_mosaic.version = 11 : i64} {
  func.func @act_kernel(%arg0: i32, %arg1: memref<8x128xbf16, #tpu.memory_space<vmem>>, %arg2: memref<128x6xbf16, #tpu.memory_space<vmem>>, %arg3: memref<1x6xf32, #tpu.memory_space<vmem>>, %arg4: memref<8x2xf32, #tpu.memory_space<vmem>>) attributes {dimension_semantics = [#tpu.dimension_semantics<parallel>], iteration_bounds = array<i64: 1>, scalar_prefetch = 0 : i64, scratch_operands = 0 : i64, tpu.core_type = #tpu.core_type<tc>, window_params = [{transform_indices = @transform_0, window_bounds = array<i64: 8, 128>}, {pipeline_mode = #tpu.pipeline_mode<synchronous>, transform_indices = @transform_1, window_bounds = array<i64: 128, 6>}, {pipeline_mode = #tpu.pipeline_mode<synchronous>, transform_indices = @transform_2, window_bounds = array<i64: 1, 6>}, {transform_indices = @transform_3, window_bounds = array<i64: 8, 2>}]} {
    %c0 = arith.constant 0 : index
    %c0_0 = arith.constant 0 : index
    %0 = vector.load %arg1[%c0, %c0_0] : memref<8x128xbf16, #tpu.memory_space<vmem>>, vector<8x128xbf16>
    %c0_1 = arith.constant 0 : index
    %c0_2 = arith.constant 0 : index
    %1 = vector.load %arg2[%c0_1, %c0_2] : memref<128x6xbf16, #tpu.memory_space<vmem>>, vector<128x6xbf16>
    %cst = arith.constant dense<0.000000e+00> : vector<8x6xf32>
    %2 = tpu.matmul %0, %1, %cst {dimension_numbers = #tpu.dot_dimension_numbers<[1], [0], [0], [1], [0, 0, 1, 1], [], []>} : vector<8x128xbf16>, vector<128x6xbf16>, vector<8x6xf32> -> vector<8x6xf32>
    %c0_3 = arith.constant 0 : index
    %c0_4 = arith.constant 0 : index
    %3 = vector.load %arg3[%c0_3, %c0_4] : memref<1x6xf32, #tpu.memory_space<vmem>>, vector<1x6xf32>
    %4 = vector.broadcast %3 : vector<1x6xf32> to vector<8x6xf32>
    %5 = arith.addf %2, %4 : vector<8x6xf32>
    %c0_5 = arith.constant 0 : index
    %c0_6 = arith.constant 0 : index
    %6 = vector.load %arg1[%c0_5, %c0_6] : memref<8x128xbf16, #tpu.memory_space<vmem>>, vector<8x6xbf16>
    %7 = arith.extf %6 : vector<8x6xbf16> to vector<8x6xf32>
    %cst_7 = arith.constant 0.000000e+00 : f32
    %8 = vector.broadcast %cst_7 : f32 to vector<8x6xf32>
    %9 = arith.cmpf oeq, %7, %8 : vector<8x6xf32>
    %cst_8 = arith.constant -1.000000e+10 : f32
    %10 = vector.broadcast %cst_8 : f32 to vector<8x6xf32>
    %11 = arith.select %9, %10, %5 : vector<8x6xi1>, vector<8x6xf32>
    %cst_9 = arith.constant dense<0xFF800000> : vector<8xf32>
    %12 = vector.multi_reduction <maximumf>, %11, %cst_9 [1] : vector<8x6xf32> to vector<8xf32>
    %13 = vector.shape_cast %12 : vector<8xf32> to vector<8x1xf32>
    %14 = tpu.iota {dimensions = array<i32: 1>} : vector<8x6xi32>
    %15 = vector.broadcast %13 : vector<8x1xf32> to vector<8x6xf32>
    %16 = arith.cmpf oeq, %11, %15 : vector<8x6xf32>
    %c6_i32 = arith.constant 6 : i32
    %17 = vector.broadcast %c6_i32 : i32 to vector<8x6xi32>
    %18 = arith.select %16, %14, %17 : vector<8x6xi1>, vector<8x6xi32>
    %cst_10 = arith.constant dense<2147483647> : vector<8xi32>
    %19 = vector.multi_reduction <minsi>, %18, %cst_10 [1] : vector<8x6xi32> to vector<8xi32>
    %20 = vector.shape_cast %19 : vector<8xi32> to vector<8x1xi32>
    %c5_i32 = arith.constant 5 : i32
    %21 = vector.broadcast %c5_i32 : i32 to vector<8x1xi32>
    %22 = arith.minsi %20, %21 : vector<8x1xi32>
    %23 = vector.broadcast %13 : vector<8x1xf32> to vector<8x6xf32>
    %24 = arith.subf %11, %23 : vector<8x6xf32>
    %25 = math.exp %24 : vector<8x6xf32>
    %cst_11 = arith.constant dense<0.000000e+00> : vector<8xf32>
    %26 = vector.multi_reduction <add>, %25, %cst_11 [1] : vector<8x6xf32> to vector<8xf32>
    %27 = vector.shape_cast %26 : vector<8xf32> to vector<8x1xf32>
    %28 = math.log %27 : vector<8x1xf32>
    %29 = arith.sitofp %22 : vector<8x1xi32> to vector<8x1xf32>
    %cst_12 = arith.constant 0.000000e+00 : f32
    %30 = vector.broadcast %cst_12 : f32 to vector<8x1xf32>
    %31 = arith.subf %30, %28 : vector<8x1xf32>
    %32 = tpu.concatenate %29, %31 in 1 : vector<8x1xf32>, vector<8x1xf32> -> vector<8x2xf32>
    %c0_13 = arith.constant 0 : index
    %c0_14 = arith.constant 0 : index
    %33 = vector.load %arg4[%c0_13, %c0_14] : memref<8x2xf32, #tpu.memory_space<vmem>>, vector<8x2xf32>
    tpu.vector_store %arg4[%c0_13, %c0_14], %32 {strides = array<i32>} : memref<8x2xf32, #tpu.memory_space<vmem>>, vector<8x2xf32>,
    return
  }
  func.func @transform_0(%arg0: i32) -> (i32, i32) {
    %c0_i32 = arith.constant 0 : i32
    %c0_i32_0 = arith.constant 0 : i32
    return %arg0, %c0_i32 : i32, i32
  }
  func.func @transform_1(%arg0: i32) -> (i32, i32) {
    %c0_i32 = arith.constant 0 : i32
    %c0_i32_0 = arith.constant 0 : i32
    %c0_i32_1 = arith.constant 0 : i32
    return %c0_i32, %c0_i32_0 : i32, i32
  }
  func.func @transform_2(%arg0: i32) -> (i32, i32) {
    %c0_i32 = arith.constant 0 : i32
    %c0_i32_0 = arith.constant 0 : i32
    %c0_i32_1 = arith.constant 0 : i32
    return %c0_i32, %c0_i32_0 : i32, i32
  }
  func.func @transform_3(%arg0: i32) -> (i32, i32) {
    %c0_i32 = arith.constant 0 : i32
    %c0_i32_0 = arith.constant 0 : i32
    return %arg0, %c0_i32 : i32, i32
  }
}

</mosaic_0001>

<bundles_post_ra>
// kernel: tpu_custom_call.1
= control target key start
LH: loop header
LB: loop body
LE: loop exit
PB: predicated region body
PF: predicated region fallthrough
CT: control target
= control target key end

     0   :  { %vm99_vm1 = vcmask 48128   ;;  %v103_v16 = vlaneseq  ;;  %vm134_vm5 = vcmask 7168   ;;  %vm136_vm6 = vcmask 15360   ;;  %s243_s1 = inlined_call_operand.vmem [shape: bf16[128,6], index: 1, kind: input, shape index: {}]   ;;  %s244_s2 = inlined_call_operand.vmem [shape: f32[1,6], index: 2, kind: input, shape index: {}]   ;;  %s245_s0 = inlined_call_operand.vmem [shape: bf16[8,128], index: 0, kind: input, shape index: {}]   ;;  %s246_s3 = inlined_call_operand.vmem [shape: f32[8,2], index: 3, kind: output, shape index: {}]  }
   0x1   :  { %v181_v0 = vld [vmem:[%s243_s1 + $0x38] sm:$0xff]  ;;  %v180_v1 = vld [vmem:[%s243_s1 + $0x30] sm:$0xff]  ;;  %v179_v2 = vld [vmem:[%s243_s1 + $0x28] sm:$0xff] }
   0x2   :  { %83 = vmatpush.bf16.msra.mxu0 %v181_v0  ;;  %v178_v3 = vld [vmem:[%s243_s1 + $0x20] sm:$0xff]  ;;  %v177_v4 = vld [vmem:[%s243_s1 + $0x18] sm:$0xff]  ;;  %v176_v5 = vld [vmem:[%s243_s1 + $0x10] sm:$0xff]  ;;  %v104_v17 = vand.u32 127, %v103_v16 }
   0x3   :  { %v175_v6 = vld [vmem:[%s243_s1 + $0x8] sm:$0xff]  ;;  %v174_v7 = vld [vmem:[%s243_s1] sm:$0xff] }
   0x4   :  { %v14_v8 = vld [vmem:[%s245_s0] sm:$0xf] }
   0x5   :  { %v96_v9 = vunpack.c.l.bf16 %v14_v8  ;;  %v182_v10 = vld [vmem:[%s244_s2] ss:$0 sm:$0xff] }
   0x6   :  { %84 = vmatpush.bf16.msra.mxu0 %v180_v1 }
   0x7   :  { %vm97_vm0 = vcmp.eq.f32.partialorder %v96_v9, 0.0 }
   0xa   :  { %85 = vmatpush.bf16.msra.mxu0 %v179_v2 }
   0xe   :  { %86 = vmatpush.bf16.msra.mxu0 %v178_v3 }
  0x12   :  { %87 = vmatpush.bf16.msra.mxu0 %v177_v4 }
  0x16   :  { %88 = vmatpush.bf16.msra.mxu0 %v176_v5 }
  0x1a   :  { %89 = vmatpush.bf16.msra.mxu0 %v175_v6 }
  0x1e   :  { %90 = vmatpush.bf16.msra.mxu0 %v174_v7 }
  0x21   :  { %91 = vmatmul.bf16.vlgmr.msra.gmra.mxu0 %v14_v8 }
  0x9e   :  { %v92_v11 = vpop.f32.mrf.mxu0 }
  0x9f   :  { %v93_v12 = vadd.f32 %v182_v10, %v92_v11 }
  0xa1   :  { %v98_v13 = vsel %vm97_vm0, -1e+10, %v93_v12 }
  0xa2   :  { %v100_v14 = vsel %vm99_vm1, %v98_v13, -inf }
  0xa3   :  { %101 = vmax.xlane.f32.xlu0 %v100_v14 }
  0xa6   :  { %v94_v15 = vpop.f32.mrf.mxu0 }
 0x116   :  { %v102_v18 = vpop.xlane.xlu0 %101 }
 0x117   :  { %vm105_vm2 = vcmp.eq.f32.partialorder %v98_v13, %v102_v18  ;;  %v124_v19 = vsub.f32 %v98_v13, %v102_v18 }
 0x118   :  { %v106_v20 = vsel %vm105_vm2, %v104_v17, 6 }
 0x119   :  { %v125_v21 = vmul.f32 1.442695, %v124_v19  ;;  %v107_v22 = vsel %vm99_vm1, %v106_v20, 2147483647 }
 0x11a   :  { %v109_v23 = vshra.s32 %v107_v22, 16  ;;  %v108_v27 = vand.u32 65535, %v107_v22 }
 0x11b   :  { %183 = vpow2.f32 %v125_v21 }
 0x11c   :  { %v111_v24 = vcvt.s32.f32 %v109_v23  ;;  %v110_v29 = vcvt.s32.f32 %v108_v27 }
 0x11e   :  { %112 = vmin.xlane.f32.xlu0 %v111_v24 }
 0x121   :  { %v184_v25 = vpop.eup %183 }
 0x122   :  { %v127_v26 = vsel %vm99_vm1, %v184_v25, 0.0 }
 0x123   :  { %128 = vadd.xlane.f32.xlu1 %v127_v26 }
 0x191   :  { %v113_v28 = vpop.xlane.xlu0 %112 }
 0x192   :  { %vm114_vm3 = vcmp.eq.f32.partialorder %v111_v24, %v113_v28  ;;  %v119_v32 = vcvt.f32.s32 %v113_v28 }
 0x193   :  { %v115_v30 = vsel %vm114_vm3, %v110_v29, inf }
 0x194   :  { %116 = vmin.xlane.f32.xlu1 %v115_v30  ;;  %v120_v35 = vshll.u32 %v119_v32, 16 }
 0x196   :  { %v129_v31 = vpop.xlane.xlu1 %128 }
 0x197   :  { %185 = vlog2.f32 %v129_v31 }
 0x19d   :  { %v186_v33 = vpop.eup %185 }
 0x19e   :  { %v131_v37 = vmul.f32 0.6931472, %v186_v33 }
 0x1a0   :  { %v133_v40 = vsub.f32 0.0, %v131_v37 }
 0x207   :  { %v117_v34 = vpop.xlane.xlu1 %116 }
 0x208   :  { %v118_v36 = vcvt.f32.s32 %v117_v34 }
 0x20a   :  { %v121_v38 = vadd.s32 %v120_v35, %v118_v36 }
 0x20c   :  { %vm122_vm4 = vcmp.lt.s32.totalorder %v121_v38, 5 }
 0x20d   :  { %v123_v39 = vsel %vm122_vm4, %v121_v38, 5 }
 0x20e   :  { %v132_v41 = vcvt.s32.f32 %v123_v39 }
 0x210   :  { %v135_v42 = vsel %vm134_vm5, %v132_v41, %v133_v40 }
 0x211   :  { %137 = vst.msk [vmem:[%s246_s3] sm:$0xff] %vm136_vm6, %v135_v42 }

</bundles_post_ra>
